<compile_context>
chip_gen: v6e
topology: v6e:2x2x1
jax: 0.10.0
libtpu: 0.0.40
codegen_flags: <defaults>
</compile_context>

<pallas_src>
import functools

import jax
import jax.numpy as jnp
from jax.experimental import pallas as pl
from jax.experimental.pallas import tpu as pltpu


def _self_attention_wide_kernel(x_ref, wqkv_ref, wu_ref, bu_ref, o_ref, *,
                                heads):
    t, e = o_ref.shape

    # One fused, lane-dense projection for all heads and all of Q/K/V.
    # bf16 operands, f32 accumulation.  The 1/e**(1/4) q/k scaling is folded
    # into the weight columns on the host.
    qkv = jnp.dot(x_ref[...], wqkv_ref[...],
                  preferred_element_type=jnp.float32)       # (t, 3*heads*e) f32

    # Single relayout to head-major; everything below is head-batched.
    qkv_h = jnp.transpose(qkv.reshape(t, 3 * heads, e),
                          (1, 0, 2))                         # (3*heads, t, e)

    q = qkv_h[:heads].astype(jnp.bfloat16)                   # (heads, t, e)
    k = qkv_h[heads:2 * heads].astype(jnp.bfloat16)          # (heads, t, e)
    v = qkv_h[2 * heads:].astype(jnp.bfloat16)               # (heads, t, e)

    # Batched QK^T over all heads at once (batch dim leading, no transpose).
    s = jnp.einsum('hqd,hkd->hqk', q, k,
                   preferred_element_type=jnp.float32)       # (heads, t, t) f32

    # One numerically-stabilized softmax chain, kept in f32.
    s = s - jnp.max(s, axis=-1, keepdims=True)
    p = jnp.exp(s)
    p = p * pl.reciprocal(jnp.sum(p, axis=-1, keepdims=True), approx=False)

    # Batched PV.
    o = jnp.einsum('hqk,hkd->hqd', p.astype(jnp.bfloat16), v,
                   preferred_element_type=jnp.float32)       # (heads, t, e) f32

    # unifyheads: head-batched (t,e)@(e,e) matmul + leading-axis reduction;
    # the (t, heads*e) concat is never materialized and o_ref is written once.
    y = jnp.einsum('hte,hef->htf', o.astype(jnp.bfloat16), wu_ref[...],
                   preferred_element_type=jnp.float32)       # (heads, t, e) f32
    o_ref[...] = (jnp.sum(y, axis=0) + bu_ref[...]).astype(o_ref.dtype)


def self_attention_wide(x, wk, wq, wv, wu, bu, heads):
    """x: (t, e) float32.  wk/wq/wv: (heads*e, e) PyTorch-layout Linear weights
    (no bias).  wu: (e, heads*e), bu: (e,).  Returns (t, e) float32."""
    t, e = x.shape
    he = heads * e
    scale = 1.0 / (float(e) ** 0.25)   # applied to both q and k, as in PyTorch

    # Host-side weight prep: pre-transpose to activation@weight layout, fold
    # the q/k scaling into the weights, fuse the three projections into a
    # single (e, 3*heads*e) operand, and cast everything the MXU touches to
    # bf16 (accumulation stays f32 inside the kernel).
    wqkv_t = jnp.concatenate([wq.T * scale, wk.T * scale, wv.T],
                             axis=1).astype(jnp.bfloat16)     # (e, 3*heads*e)
    wu_h = wu.T.reshape(heads, e, e).astype(jnp.bfloat16)     # head-major unify
    bu2 = bu.reshape(1, e).astype(jnp.float32)
    x_bf16 = x.astype(jnp.bfloat16)

    kernel = functools.partial(_self_attention_wide_kernel, heads=heads)

    out = pl.pallas_call(
        kernel,
        out_shape=jax.ShapeDtypeStruct((t, e), jnp.float32),
        grid_spec=pltpu.PrefetchScalarGridSpec(
            num_scalar_prefetch=0,
            grid=(1,),                                   # single grid step
            in_specs=[
                pl.BlockSpec((t, e), lambda i: (0, 0)),            # x (bf16)
                pl.BlockSpec((e, 3 * he), lambda i: (0, 0)),       # fused QKV W^T
                pl.BlockSpec((heads, e, e), lambda i: (0, 0, 0)),  # unify W, head-major
                pl.BlockSpec((1, e), lambda i: (0, 0)),            # unify bias
            ],
            out_specs=pl.BlockSpec((t, e), lambda i: (0, 0)),
        ),
        compiler_params=pltpu.CompilerParams(
            dimension_semantics=("arbitrary",)),
    )(x_bf16, wqkv_t, wu_h, bu2)
    return out


def _reference(x, wk, wq, wv, wu, bu, heads):
    """Plain-JAX (f32) reproduction of the PyTorch forward (for verification)."""
    t, e = x.shape
    h = heads
    keys = (x @ wk.T).reshape(1, t, h, e)
    queries = (x @ wq.T).reshape(1, t, h, e)
    values = (x @ wv.T).reshape(1, t, h, e)
    keys = jnp.transpose(keys, (0, 2, 1, 3)).reshape(h, t, e)
    queries = jnp.transpose(queries, (0, 2, 1, 3)).reshape(h, t, e)
    values = jnp.transpose(values, (0, 2, 1, 3)).reshape(h, t, e)
    queries = queries / (e ** 0.25)
    keys = keys / (e ** 0.25)
    dot = jnp.einsum('hte,hse->hts', queries, keys)
    dot = jax.nn.softmax(dot, axis=2)
    out = jnp.einsum('hts,hse->hte', dot, values)          # (h, t, e)
    out = jnp.transpose(out, (1, 0, 2)).reshape(t, h * e)
    return out @ wu.T + bu


if __name__ == "__main__":
    heads = 8
    t, e = 8, 32        # small shapes consistent with the module's forward

    key = jax.random.PRNGKey(0)
    kx, kk, kq, kv, ku, kb = jax.random.split(key, 6)

    x = jax.random.normal(kx, (t, e), dtype=jnp.float32)
    # PyTorch-layout Linear weights (out_features, in_features).
    wk = jax.random.normal(kk, (heads * e, e), dtype=jnp.float32) * 0.05
    wq = jax.random.normal(kq, (heads * e, e), dtype=jnp.float32) * 0.05
    wv = jax.random.normal(kv, (heads * e, e), dtype=jnp.float32) * 0.05
    wu = jax.random.normal(ku, (e, heads * e), dtype=jnp.float32) * 0.05
    bu = jax.random.normal(kb, (e,), dtype=jnp.float32) * 0.05

    out = self_attention_wide(x, wk, wq, wv, wu, bu, heads)
    out = jax.block_until_ready(out)

    ref = _reference(x, wk, wq, wv, wu, bu, heads)
    assert out.shape == (t, e)
    # bf16 MXU operands (f32 accumulation) -> loosened tolerance vs the pure
    # f32 reference; structural errors would be orders of magnitude larger.
    assert jnp.allclose(out, ref, atol=5e-2, rtol=5e-2), (
        float(jnp.max(jnp.abs(out - ref))))

    print("KERNEL_OK")
</pallas_src>

<mosaic_0001>
module attributes {stable_mosaic.version = 11 : i64} {
  func.func @_self_attention_wide_kernel(%arg0: i32, %arg1: memref<8x32xbf16, #tpu.memory_space<vmem>>, %arg2: memref<32x768xbf16, #tpu.memory_space<vmem>>, %arg3: memref<8x32x32xbf16, #tpu.memory_space<vmem>>, %arg4: memref<1x32xf32, #tpu.memory_space<vmem>>, %arg5: memref<8x32xf32, #tpu.memory_space<vmem>>) attributes {dimension_semantics = [#tpu.dimension_semantics<arbitrary>], iteration_bounds = array<i64: 1>, scalar_prefetch = 0 : i64, scratch_operands = 0 : i64, tpu.core_type = #tpu.core_type<tc>, window_params = [{pipeline_mode = #tpu.pipeline_mode<synchronous>, transform_indices = @transform_0, window_bounds = array<i64: 8, 32>}, {pipeline_mode = #tpu.pipeline_mode<synchronous>, transform_indices = @transform_1, window_bounds = array<i64: 32, 768>}, {pipeline_mode = #tpu.pipeline_mode<synchronous>, transform_indices = @transform_2, window_bounds = array<i64: 8, 32, 32>}, {pipeline_mode = #tpu.pipeline_mode<synchronous>, transform_indices = @transform_3, window_bounds = array<i64: 1, 32>}, {pipeline_mode = #tpu.pipeline_mode<synchronous>, transform_indices = @transform_4, window_bounds = array<i64: 8, 32>}]} {
    %c0 = arith.constant 0 : index
    %c0_0 = arith.constant 0 : index
    %0 = vector.load %arg1[%c0, %c0_0] : memref<8x32xbf16, #tpu.memory_space<vmem>>, vector<8x32xbf16>
    %c0_1 = arith.constant 0 : index
    %c0_2 = arith.constant 0 : index
    %1 = vector.load %arg2[%c0_1, %c0_2] : memref<32x768xbf16, #tpu.memory_space<vmem>>, vector<32x768xbf16>
    %cst = arith.constant dense<0.000000e+00> : vector<8x768xf32>
    %2 = tpu.matmul %0, %1, %cst {dimension_numbers = #tpu.dot_dimension_numbers<[1], [0], [0], [1], [0, 0, 1, 1], [], []>} : vector<8x32xbf16>, vector<32x768xbf16>, vector<8x768xf32> -> vector<8x768xf32>
    %3 = vector.shape_cast %2 : vector<8x768xf32> to vector<8x24x32xf32>
    %4 = tpu.transpose %3, [1, 0, 2] : vector<8x24x32xf32> -> vector<24x8x32xf32>
    %5 = vector.extract_strided_slice %4 {offsets = [0, 0, 0], sizes = [8, 8, 32], strides = [1, 1, 1]} : vector<24x8x32xf32> to vector<8x8x32xf32>
    %6 = arith.truncf %5 : vector<8x8x32xf32> to vector<8x8x32xbf16>
    %7 = vector.extract_strided_slice %4 {offsets = [8, 0, 0], sizes = [8, 8, 32], strides = [1, 1, 1]} : vector<24x8x32xf32> to vector<8x8x32xf32>
    %8 = arith.truncf %7 : vector<8x8x32xf32> to vector<8x8x32xbf16>
    %9 = vector.extract_strided_slice %4 {offsets = [16, 0, 0], sizes = [8, 8, 32], strides = [1, 1, 1]} : vector<24x8x32xf32> to vector<8x8x32xf32>
    %10 = arith.truncf %9 : vector<8x8x32xf32> to vector<8x8x32xbf16>
    "tpu.trace_start"() <{level = 10 : i32, message = "hqd,hkd->hqk"}> : () -> ()
    %cst_3 = arith.constant dense<0.000000e+00> : vector<8x8x8xf32>
    %11 = tpu.matmul %6, %8, %cst_3 {dimension_numbers = #tpu.dot_dimension_numbers<[2], [2], [1], [1], [0, 0, 0, 1, 1, 1], [0], [0]>} : vector<8x8x32xbf16>, vector<8x8x32xbf16>, vector<8x8x8xf32> -> vector<8x8x8xf32>
    "tpu.trace_stop"() : () -> ()
    %cst_4 = arith.constant dense<0xFF800000> : vector<8x8xf32>
    %12 = vector.multi_reduction <maximumf>, %11, %cst_4 [2] : vector<8x8x8xf32> to vector<8x8xf32>
    %13 = vector.shape_cast %12 : vector<8x8xf32> to vector<8x8x1xf32>
    %14 = vector.broadcast %13 : vector<8x8x1xf32> to vector<8x8x8xf32>
    %15 = arith.subf %11, %14 : vector<8x8x8xf32>
    %16 = math.exp %15 : vector<8x8x8xf32>
    %cst_5 = arith.constant dense<0.000000e+00> : vector<8x8xf32>
    %17 = vector.multi_reduction <add>, %16, %cst_5 [2] : vector<8x8x8xf32> to vector<8x8xf32>
    %18 = vector.shape_cast %17 : vector<8x8xf32> to vector<8x8x1xf32>
    %19 = tpu.reciprocal %18 : vector<8x8x1xf32> -> vector<8x8x1xf32>
    %20 = vector.broadcast %19 : vector<8x8x1xf32> to vector<8x8x8xf32>
    %21 = arith.mulf %16, %20 : vector<8x8x8xf32>
    %22 = arith.truncf %21 : vector<8x8x8xf32> to vector<8x8x8xbf16>
    "tpu.trace_start"() <{level = 10 : i32, message = "hqk,hkd->hqd"}> : () -> ()
    %cst_6 = arith.constant dense<0.000000e+00> : vector<8x8x32xf32>
    %23 = tpu.matmul %22, %10, %cst_6 {dimension_numbers = #tpu.dot_dimension_numbers<[2], [1], [1], [2], [0, 0, 0, 1, 1, 2], [0], [0]>} : vector<8x8x8xbf16>, vector<8x8x32xbf16>, vector<8x8x32xf32> -> vector<8x8x32xf32>
    "tpu.trace_stop"() : () -> ()
    %24 = arith.truncf %23 : vector<8x8x32xf32> to vector<8x8x32xbf16>
    %c0_7 = arith.constant 0 : index
    %c0_8 = arith.constant 0 : index
    %c0_9 = arith.constant 0 : index
    %25 = vector.load %arg3[%c0_7, %c0_8, %c0_9] : memref<8x32x32xbf16, #tpu.memory_space<vmem>>, vector<8x32x32xbf16>
    "tpu.trace_start"() <{level = 10 : i32, message = "hte,hef->htf"}> : () -> ()
    %cst_10 = arith.constant dense<0.000000e+00> : vector<8x8x32xf32>
    %26 = tpu.matmul %24, %25, %cst_10 {dimension_numbers = #tpu.dot_dimension_numbers<[2], [1], [1], [2], [0, 0, 0, 1, 1, 2], [0], [0]>} : vector<8x8x32xbf16>, vector<8x32x32xbf16>, vector<8x8x32xf32> -> vector<8x8x32xf32>
    "tpu.trace_stop"() : () -> ()
    %cst_11 = arith.constant dense<0.000000e+00> : vector<8x32xf32>
    %27 = vector.multi_reduction <add>, %26, %cst_11 [0] : vector<8x8x32xf32> to vector<8x32xf32>
    %c0_12 = arith.constant 0 : index
    %c0_13 = arith.constant 0 : index
    %28 = vector.load %arg4[%c0_12, %c0_13] : memref<1x32xf32, #tpu.memory_space<vmem>>, vector<1x32xf32>
    %29 = vector.broadcast %28 : vector<1x32xf32> to vector<8x32xf32>
    %30 = arith.addf %27, %29 : vector<8x32xf32>
    %c0_14 = arith.constant 0 : index
    %c0_15 = arith.constant 0 : index
    %31 = vector.load %arg5[%c0_14, %c0_15] : memref<8x32xf32, #tpu.memory_space<vmem>>, vector<8x32xf32>
    tpu.vector_store %arg5[%c0_14, %c0_15], %30 {strides = array<i32>} : memref<8x32xf32, #tpu.memory_space<vmem>>, vector<8x32xf32>,
    return
  }
  func.func @transform_0(%arg0: i32) -> (i32, i32) {
    %c0_i32 = arith.constant 0 : i32
    %c0_i32_0 = arith.constant 0 : i32
    %c0_i32_1 = arith.constant 0 : i32
    return %c0_i32, %c0_i32_0 : i32, i32
  }
  func.func @transform_1(%arg0: i32) -> (i32, i32) {
    %c0_i32 = arith.constant 0 : i32
    %c0_i32_0 = arith.constant 0 : i32
    %c0_i32_1 = arith.constant 0 : i32
    return %c0_i32, %c0_i32_0 : i32, i32
  }
  func.func @transform_2(%arg0: i32) -> (i32, i32, i32) {
    %c0_i32 = arith.constant 0 : i32
    %c0_i32_0 = arith.constant 0 : i32
    %c0_i32_1 = arith.constant 0 : i32
    %c0_i32_2 = arith.constant 0 : i32
    return %c0_i32, %c0_i32_0, %c0_i32_1 : i32, i32, i32
  }
  func.func @transform_3(%arg0: i32) -> (i32, i32) {
    %c0_i32 = arith.constant 0 : i32
    %c0_i32_0 = arith.constant 0 : i32
    %c0_i32_1 = arith.constant 0 : i32
    return %c0_i32, %c0_i32_0 : i32, i32
  }
  func.func @transform_4(%arg0: i32) -> (i32, i32) {
    %c0_i32 = arith.constant 0 : i32
    %c0_i32_0 = arith.constant 0 : i32
    %c0_i32_1 = arith.constant 0 : i32
    return %c0_i32, %c0_i32_0 : i32, i32
  }
}

</mosaic_0001>

<bundles_post_ra>
// kernel: tpu_custom_call.1
= control target key start
LH: loop header
LB: loop body
LE: loop exit
PB: predicated region body
PF: predicated region fallthrough
CT: control target
= control target key end

     0   :  { %9 = vsyncpa [#allocation3], 0  ;;  %s3406_s0 = inlined_call_operand.hbm [shape: bf16[8,32], index: 0, kind: input, shape index: {}]   ;;  %s3407_s1 = inlined_call_operand.hbm [shape: bf16[32,768], index: 1, kind: input, shape index: {}]   ;;  %s3408_s2 = inlined_call_operand.hbm [shape: bf16[8,32,32], index: 2, kind: input, shape index: {}]   ;;  %s3409_s3 = inlined_call_operand.vmem [shape: f32[1,32], index: 3, kind: input, shape index: {}]   ;;  %s3410_s4 = inlined_call_operand.hbm [shape: f32[8,32], index: 4, kind: output, shape index: {}]  }
   0x1   :  { %10 = vsyncpa [#allocation6], 0 }
   0x2   :  { %11 = vsyncpa [#allocation4], 0  ;;  %s2975_s15 = smov [#allocation5]  }
   0x3   :  { %s27_s16 = sshll.u32 %s2975_s15, 4  ;;  %s28_s16 = int_to_ptr.vmem [resolvable:$true] %s27_s16 }
   0x4   :  { %s2897_s17 = scalar_lea.vmem %s28_s16, 1536  ;;  %p2902_p1 = scmp.lt.s32.totalorder %s28_s16, %s28_s16 }
   0x5   :  { %p2898_p0 = scmp.ne.s32.totalorder %s28_s16, %s2897_s17  ;;  %p2903_p2 = scmp.lt.s32.totalorder %s2897_s17, %s2897_s17 }
   0x7   :  { %p2904_p3 = por %p2903_p2, %p2902_p1 }
   0x9   :  { %p2905_p4 = pnand %p2904_p3, %p2898_p0 }
   0xb   :  { %2908 = shalt.err (!%p2905_p4)
}
   0xc   :  { %s2976_s18 = smov 384   ;;  %s2977_s19 = smov 24  }
   0xd   :  { %33 = dma.hbm_to_vmem [thread:$0]  %s3407_s1, 1536, %s28_s16, [#allocation6], %s2976_s18, %s2976_s18, %s2977_s19  }
   0xe   :  { %s2978_s22 = smov [#allocation2]   ;;  %s2979_s24 = smov [#allocation7]  }
   0xf   :  { %s18_s23 = sshll.u32 %s2978_s22, 4  ;;  %s39_s25 = sshll.u32 %s2979_s24, 4  ;;  %s19_s23 = int_to_ptr.vmem [resolvable:$true] %s18_s23  ;;  %s40_s25 = int_to_ptr.vmem [resolvable:$true] %s39_s25 }
  0x10   :  { %s2917_s26 = scalar_lea.vmem %s19_s23, 64  ;;  %p2922_p6 = scmp.lt.s32.totalorder %s19_s23, %s19_s23 }
  0x11   :  { %p2918_p5 = scmp.ne.s32.totalorder %s19_s23, %s2917_s26  ;;  %p2923_p7 = scmp.lt.s32.totalorder %s2917_s26, %s2917_s26 }
  0x13   :  { %p2924_p8 = por %p2923_p7, %p2922_p6 }
  0x15   :  { %p2925_p9 = pnand %p2924_p8, %p2918_p5 }
  0x17   :  { %2928 = shalt.err (!%p2925_p9)
}
  0x18   :  { %21 = dma.hbm_to_vmem [thread:$0]  %s3406_s0, 64, %s19_s23, [#allocation3]  }
  0x19   :  { %s2937_s29 = scalar_lea.vmem %s40_s25, 2048  ;;  %p2942_p11 = scmp.lt.s32.totalorder %s40_s25, %s40_s25 }
  0x1a   :  { %p2938_p10 = scmp.ne.s32.totalorder %s40_s25, %s2937_s29  ;;  %p2943_p12 = scmp.lt.s32.totalorder %s2937_s29, %s2937_s29 }
  0x1c   :  { %p2944_p13 = por %p2943_p12, %p2942_p11 }
  0x1e   :  { %p2945_p0 = pnand %p2944_p13, %p2938_p10 }
  0x20   :  { %2948 = shalt.err (!%p2945_p0)
}
  0x21   :  { %s2980_s1 = smov 64   ;;  %s2981_s30 = smov 4  }
  0x22   :  { %45 = dma.hbm_to_vmem [thread:$0]  %s3408_s2, 2048, %s40_s25, [#allocation6], %s2980_s1, %s2980_s1, %s2981_s30  }
  0x23   :  { %2969 = dma.done.wait [#allocation3], 64  }
  0x24   :  { %2970 = vsyncadd [#allocation3], 4294967232 }
  0x25   :  { %2971 = dma.done.wait [#allocation6], 3584  }
  0x26   :  { %2972 = vsyncadd [#allocation6], 4294963712  ;;  %v2982_v0 = vmov 0   ;;  %v2823_v1 = vld [vmem:[#allocation5 + $0x3c] ss:$24 sps:$4 sm:$0xff]   ;;  %vm131_vm0 = vcmask 261120   ;;  %v323_v29 = vlaneseq }
  0x27   :  { %208 = vmatprep.mubr.bf16.mxu1 %v2982_v0  ;;  %167 = vmatprep.mubr.bf16.mxu0 %v2982_v0  ;;  %v2825_v2 = vld [vmem:[#allocation5 + $0x38] ss:$24 sps:$4 sm:$0xff]   ;;  %v2826_v3 = vld [vmem:[#allocation5 + $0x34] ss:$24 sps:$4 sm:$0xff]   ;;  %v2831_v6 = vld [vmem:[#allocation5 + $0x8] ss:$24 sps:$4 sm:$0xff]  }
  0x28   :  { %188 = vmatprep.subr.bf16.mxu1 %v2823_v1  ;;  %v2828_v4 = vld [vmem:[#allocation5 + $0x30] ss:$24 sps:$4 sm:$0xff]   ;;  %v2829_v5 = vld [vmem:[#allocation5 + $0xc] ss:$24 sps:$4 sm:$0xff]   ;;  %147 = vmatprep.subr.bf16.mxu0 %v2826_v3  ;;  %v2834_v8 = vld [vmem:[#allocation5] ss:$24 sps:$4 sm:$0xff]  }
  0x29   :  { %189 = vmatpush1.bf16.msra.mxu1 %v2825_v2  ;;  %v2832_v7 = vld [vmem:[#allocation5 + $0x4] ss:$24 sps:$4 sm:$0xff]   ;;  %148 = vmatpush1.bf16.msra.mxu0 %v2828_v4  ;;  %v2835_v10 = vld [vmem:[#allocation5 + $0x40] ss:$24 sps:$4 sm:$0xff]   ;;  %v2840_v12 = vld [vmem:[#allocation5 + $0x14] ss:$24 sps:$4 sm:$0xff]  }
  0x2a   :  { %190 = vmatprep.subr.bf16.mxu1 %v2829_v5  ;;  %v58_v9 = vld [vmem:[#allocation2] sm:$0xf]  ;;  %149 = vmatprep.subr.bf16.mxu0 %v2832_v7  ;;  %v2838_v13 = vld [vmem:[#allocation5 + $0x10] ss:$24 sps:$4 sm:$0xff]   ;;  %s2983_s0 = smov 32   ;;  %s2984_s2 = smov 96  }
  0x2b   :  { %v2837_v11 = vld [vmem:[#allocation5 + $0x44] ss:$24 sps:$4 sm:$0xff]   ;;  %v2985_v22 = vmov 0.0   ;;  %vm2986_vm1 = vmmov 0   ;;  %v2987_v27 = vmov 1983009808  }
  0x2c   :  { %v321_v28 = vunpack.c.l.s4 %v2987_v27  ;;  %v2988_v30 = vmov 1934713408   ;;  %v324_v33 = vshrl.u32 %v323_v29, 7  ;;  %vm1526_vm2 = vcmask 64512   ;;  %s2989_s9 = smov [#allocation8]  }
  0x2d   :  { %191 = vmatpush1.bf16.msra.mxu1 %v2831_v6  ;;  %150 = vmatpush1.bf16.msra.mxu0 %v2834_v8  ;;  %v385_v31 = vunpack.c.l.s4 %v2988_v30  ;;  %vm1626_vm3 = vcmask 1043456   ;;  %s2502_s10 = sshll.u32 %s2989_s9, 4  ;;  %s2503_s10 = int_to_ptr.vmem [resolvable:$true] %s2502_s10 }
  0x2e   :  { %229 = vmatprep.subr.bf16.mxu0 %v2837_v11  ;;  %2648 = vmatprep.subr.bf16.mxu1 %v2985_v22  ;;  %v322_v32 = vunpack.c.0.s8 %v321_v28  ;;  %s2949_s11 = scalar_lea.vmem %s2503_s10, 128  ;;  %p2954_p2 = scmp.lt.s32.totalorder %s2503_s10, %s2503_s10 }
  0x2f   :  { %v386_v36 = vunpack.c.0.s8 %v385_v31  ;;  %p2950_p1 = scmp.ne.s32.totalorder %s2503_s10, %s2949_s11  ;;  %p2955_p3 = scmp.lt.s32.totalorder %s2949_s11, %s2949_s11 }
  0x30   :  { %2525 = vmatmul.mubr.msk.bf16.vlgmr.msra.gmra.mxu1 %vm131_vm0, %v58_v9  ;;  %2524 = vmatmul.mubr.msk.bf16.vlgmr.msra.gmra.mxu0 %vm131_vm0, %v58_v9  ;;  %v3068_v37 = vsub.s32 %v322_v32, %v324_v33 }
  0x31   :  { %249 = vmatprep.mubr.bf16.mxu0 %v2982_v0  ;;  %230 = vmatpush1.bf16.msra.mxu0 %v2835_v10  ;;  %v3070_v44 = vsub.s32 %v386_v36, %v324_v33  ;;  %p2956_p4 = por %p2955_p3, %p2954_p2 }
  0x32   :  { %231 = vmatprep.subr.bf16.mxu0 %v2840_v12  ;;  %2650 = vmatprep.mubr.msk.bf16.mxu1 %vm2986_vm1, %v2985_v22 }
  0x33   :  { %p2957_p5 = pnand %p2956_p4, %p2950_p1 }
  0x35   :  { %232 = vmatpush1.bf16.msra.mxu0 %v2838_v13 }
  0x36   :  { %2654 = vmatprep.subr.bf16.mxu0 %v2985_v22 }
  0x38   :  { %2526 = vmatmul.mubr.msk.bf16.vlgmr.msra.gmra.mxu0 %vm131_vm0, %v58_v9 }
  0x39   :  { %2656 = vmatprep.mubr.msk.bf16.mxu0 %vm2986_vm1, %v2985_v22 }
  0xf0   :  { %v210_v14 = vpop.f32.mrf.mxu1  ;;  %v3033_v16 = vpop.f32.mrf.mxu0 }
  0xf1   :  { %285 = vrot.lane.b32.xlu1 %v210_v14, %s2983_s0  ;;  %279 = vrot.lane.b32.xlu0 %v210_v14, %s2984_s2 }
  0xf2   :  { %v3031_v15 = vpop.f32.mrf.mxu1  ;;  %v3035_v18 = vpop.f32.mrf.mxu0 }
  0xf4   :  { %v214_v17 = vpop.f32.mrf.mxu1  ;;  %v173_v20 = vpop.f32.mrf.mxu0 }
  0xf5   :  { %282 = vrot.lane.b32.xlu0 %v210_v14, %s2980_s1  ;;  %259 = vrot.lane.b32.xlu1 %v3033_v16, %s2984_s2 }
  0xf6   :  { %v215_v19 = vpop.f32.mrf.mxu1  ;;  %v174_v21 = vpop.f32.mrf.mxu0 }
  0xf8   :  { %v3062_v23 = vpop.f32.mrf.mxu0 }
  0xf9   :  { %262 = vrot.lane.b32.xlu0 %v3033_v16, %s2980_s1  ;;  %265 = vrot.lane.b32.xlu1 %v3033_v16, %s2983_s0 }
  0xfa   :  { %v3066_v24 = vpop.f32.mrf.mxu0 }
  0xfc   :  { %v255_v25 = vpop.f32.mrf.mxu0 }
  0xfd   :  { %289 = vrot.lane.b32.xlu0 %v3031_v15, %s2984_s2  ;;  %292 = vrot.lane.b32.xlu1 %v3031_v15, %s2980_s1 }
  0xfe   :  { %v256_v26 = vpop.f32.mrf.mxu0 }
 0x101   :  { %295 = vrot.lane.b32.xlu0 %v3031_v15, %s2983_s0  ;;  %269 = vrot.lane.b32.xlu1 %v3035_v18, %s2984_s2 }
 0x105   :  { %272 = vrot.lane.b32.xlu0 %v3035_v18, %s2980_s1  ;;  %275 = vrot.lane.b32.xlu1 %v3035_v18, %s2983_s0 }
 0x109   :  { %299 = vrot.lane.b32.xlu1 %v3062_v23, %s2984_s2 }
 0x163   :  { %v286_v34 = vpop.permute.xlu1 %285  ;;  %v280_v35 = vpop.permute.xlu0 %279 }
 0x164   :  { %v470_v38 = vcombine.low %v280_v35, %v286_v34  ;;  %v471_v39 = vcombine.high %v280_v35, %v286_v34 }
 0x166   :  { %v478_v45 = vrot.slane %v470_v38, %v3068_v37  ;;  %v485_v46 = vrot.slane %v471_v39, %v3068_v37 }
 0x167   :  { %v283_v40 = vpop.permute.xlu0 %282  ;;  %v260_v41 = vpop.permute.xlu1 %259 }
 0x168   :  { %v454_v42 = vcombine.low %v210_v14, %v283_v40  ;;  %v455_v43 = vcombine.high %v210_v14, %v283_v40 }
 0x16a   :  { %v462_v47 = vrot.slane %v454_v42, %v3068_v37  ;;  %v469_v48 = vrot.slane %v455_v43, %v3068_v37 }
 0x16b   :  { %v263_v49 = vpop.permute.xlu0 %262  ;;  %v266_v50 = vpop.permute.xlu1 %265 }
 0x16c   :  { %v518_v51 = vcombine.low %v462_v47, %v478_v45  ;;  %v519_v52 = vcombine.high %v462_v47, %v478_v45  ;;  %v534_v53 = vcombine.low %v469_v48, %v485_v46  ;;  %v535_v54 = vcombine.high %v469_v48, %v485_v46 }
 0x16d   :  { %v318_v55 = vcombine.low %v3033_v16, %v263_v49  ;;  %v319_v56 = vcombine.high %v3033_v16, %v263_v49  ;;  %v334_v57 = vcombine.low %v260_v41, %v266_v50  ;;  %v335_v58 = vcombine.high %v260_v41, %v266_v50 }
 0x16e   :  { %v526_v59 = vrot.slane %v518_v51, %v3070_v44  ;;  %v533_v60 = vrot.slane %v519_v52, %v3070_v44  ;;  %v542_v61 = vrot.slane %v534_v53, %v3070_v44  ;;  %v549_v62 = vrot.slane %v535_v54, %v3070_v44 }
 0x16f   :  { %v326_v63 = vrot.slane %v318_v55, %v3068_v37  ;;  %v333_v0 = vrot.slane %v319_v56, %v3068_v37  ;;  %v342_v1 = vrot.slane %v334_v57, %v3068_v37  ;;  %v349_v2 = vrot.slane %v335_v58, %v3068_v37  ;;  %v290_v3 = vpop.permute.xlu0 %289  ;;  %v293_v4 = vpop.permute.xlu1 %292 }
 0x170   :  { %v2535_v9 = vcombine.low %v526_v59, %v533_v60  ;;  %v2537_v10 = vcombine.high %v526_v59, %v533_v60  ;;  %v2539_v11 = vcombine.low %v542_v61, %v549_v62  ;;  %v2541_v12 = vcombine.high %v542_v61, %v549_v62 }
 0x171   :  { %v382_v5 = vcombine.low %v326_v63, %v342_v1  ;;  %v383_v6 = vcombine.high %v326_v63, %v342_v1  ;;  %v398_v7 = vcombine.low %v333_v0, %v349_v2  ;;  %v399_v8 = vcombine.high %v333_v0, %v349_v2 }
 0x172   :  { %v486_v21 = vcombine.low %v3031_v15, %v293_v4  ;;  %v487_v25 = vcombine.high %v3031_v15, %v293_v4  ;;  %v870_v42 = vrot.slane %v2535_v9, %v3068_v37  ;;  %v886_v43 = vrot.slane %v2537_v10, %v3068_v37 }
 0x173   :  { %v390_v13 = vrot.slane %v382_v5, %v3070_v44  ;;  %v397_v14 = vrot.slane %v383_v6, %v3070_v44  ;;  %v406_v16 = vrot.slane %v398_v7, %v3070_v44  ;;  %v413_v17 = vrot.slane %v399_v8, %v3070_v44  ;;  %v296_v19 = vpop.permute.xlu0 %295  ;;  %v270_v20 = vpop.permute.xlu1 %269 }
 0x174   :  { %v502_v26 = vcombine.low %v290_v3, %v296_v19  ;;  %v503_v27 = vcombine.high %v290_v3, %v296_v19  ;;  %v494_v32 = vrot.slane %v486_v21, %v3068_v37  ;;  %v501_v33 = vrot.slane %v487_v25, %v3068_v37 }
 0x175   :  { %v2527_v28 = vcombine.low %v390_v13, %v397_v14  ;;  %v2529_v29 = vcombine.high %v390_v13, %v397_v14  ;;  %v2531_v30 = vcombine.low %v406_v16, %v413_v17  ;;  %v2533_v31 = vcombine.high %v406_v16, %v413_v17 }
 0x176   :  { %v510_v34 = vrot.slane %v502_v26, %v3068_v37  ;;  %v517_v35 = vrot.slane %v503_v27, %v3068_v37  ;;  %v902_v45 = vrot.slane %v2539_v11, %v3068_v37  ;;  %v918_v46 = vrot.slane %v2541_v12, %v3068_v37 }
 0x177   :  { %v273_v41 = vpop.permute.xlu0 %272  ;;  %v276_v15 = vpop.permute.xlu1 %275  ;;  %v3101_v47 = vrot.slane %v2527_v28, %v3068_v37  ;;  %v3104_v48 = vrot.slane %v2529_v29, %v3068_v37  ;;  %v3107_v49 = vrot.slane %v2531_v30, %v3068_v37  ;;  %v3110_v50 = vrot.slane %v2533_v31, %v3068_v37 }
 0x178   :  { %v550_v36 = vcombine.low %v494_v32, %v510_v34  ;;  %v551_v38 = vcombine.high %v494_v32, %v510_v34  ;;  %v566_v39 = vcombine.low %v501_v33, %v517_v35  ;;  %v567_v40 = vcombine.high %v501_v33, %v517_v35 }
 0x179   :  { %v350_v51 = vcombine.low %v3035_v18, %v273_v41  ;;  %v351_v52 = vcombine.high %v3035_v18, %v273_v41  ;;  %v366_v53 = vcombine.low %v270_v20, %v276_v15  ;;  %v367_v54 = vcombine.high %v270_v20, %v276_v15 }
 0x17a   :  { %v558_v55 = vrot.slane %v550_v36, %v3070_v44  ;;  %v565_v56 = vrot.slane %v551_v38, %v3070_v44  ;;  %v574_v57 = vrot.slane %v566_v39, %v3070_v44  ;;  %v581_v58 = vrot.slane %v567_v40, %v3070_v44 }
 0x17b   :  { %v358_v59 = vrot.slane %v350_v51, %v3068_v37  ;;  %v365_v60 = vrot.slane %v351_v52, %v3068_v37  ;;  %v374_v61 = vrot.slane %v366_v53, %v3068_v37  ;;  %v381_v62 = vrot.slane %v367_v54, %v3068_v37 }
 0x17c   :  { %v790_v18 = vcombine.low %v3101_v47, %v3104_v48  ;;  %v822_v63 = vcombine.low %v3107_v49, %v3110_v50  ;;  %v2536_v2 = vcombine.low %v558_v55, %v565_v56  ;;  %v2538_v3 = vcombine.high %v558_v55, %v565_v56 }
 0x17d   :  { %v414_v0 = vcombine.low %v358_v59, %v374_v61  ;;  %v415_v1 = vcombine.high %v358_v59, %v374_v61  ;;  %v926_v4 = vcombine.low %v870_v42, %v886_v43  ;;  %v958_v5 = vcombine.low %v902_v45, %v918_v46 }
 0x17e   :  { %v2540_v6 = vcombine.low %v574_v57, %v581_v58  ;;  %v2542_v7 = vcombine.high %v574_v57, %v581_v58  ;;  %v430_v8 = vcombine.low %v365_v60, %v381_v62  ;;  %v431_v9 = vcombine.high %v365_v60, %v381_v62 }
 0x17f   :  { %v791_v10 = vcombine.high %v3101_v47, %v3104_v48  ;;  %v823_v11 = vcombine.high %v3107_v49, %v3110_v50  ;;  %v934_v12 = vrot.slane %v926_v4, %v3070_v44  ;;  %v966_v13 = vrot.slane %v958_v5, %v3070_v44 }
 0x180   :  { %v422_v14 = vrot.slane %v414_v0, %v3070_v44  ;;  %v429_v16 = vrot.slane %v415_v1, %v3070_v44  ;;  %v798_v17 = vrot.slane %v790_v18, %v3070_v44  ;;  %v830_v19 = vrot.slane %v822_v63, %v3070_v44 }
 0x181   :  { %v3137_v20 = vrot.slane %v2536_v2, %v3068_v37  ;;  %v893_v21 = vrot.slane %v2538_v3, %v3068_v37  ;;  %v990_v25 = vcombine.low %v934_v12, %v966_v13  ;;  %v991_v26 = vcombine.high %v934_v12, %v966_v13 }
 0x182   :  { %v909_v27 = vrot.slane %v2540_v6, %v3068_v37  ;;  %v925_v28 = vrot.slane %v2542_v7, %v3068_v37  ;;  %v438_v29 = vrot.slane %v430_v8, %v3070_v44  ;;  %v445_v30 = vrot.slane %v431_v9, %v3070_v44 }
 0x183   :  { %v1142_v31 = vpack.c.bf16 %v990_v25, %v990_v25  ;;  %v1143_v32 = vpack.c.bf16 %v991_v26, %v991_v26  ;;  %v927_v33 = vcombine.high %v870_v42, %v886_v43  ;;  %v959_v34 = vcombine.high %v902_v45, %v918_v46 }
 0x184   :  { %v2528_v35 = vcombine.low %v422_v14, %v429_v16  ;;  %v2530_v36 = vcombine.high %v422_v14, %v429_v16  ;;  %v854_v38 = vcombine.low %v798_v17, %v830_v19  ;;  %v855_v39 = vcombine.high %v798_v17, %v830_v19 }
 0x185   :  { %v1162_v40 = vsel %vm131_vm0, %v1142_v31, 0  ;;  %v1208_v41 = vsel %vm131_vm0, %v1143_v32, 0  ;;  %v941_v15 = vrot.slane %v927_v33, %v3070_v44  ;;  %v973_v47 = vrot.slane %v959_v34, %v3070_v44 }
 0x186   :  { %v2532_v48 = vcombine.low %v438_v29, %v445_v30  ;;  %v2534_v49 = vcombine.high %v438_v29, %v445_v30  ;;  %2649 = vmatpush3.bf16.xpose.msra.mxu1 %v1162_v40  ;;  %2655 = vmatpush3.bf16.xpose.msra.mxu0 %v1208_v41  ;;  %v942_v50 = vcombine.low %v3137_v20, %v893_v21 }
 0x187   :  { %2660 = vmatprep.subr.bf16.mxu1 %v2985_v22  ;;  %2666 = vmatprep.subr.bf16.mxu0 %v2985_v22  ;;  %v992_v42 = vcombine.low %v941_v15, %v973_v47  ;;  %v993_v43 = vcombine.high %v941_v15, %v973_v47  ;;  %v974_v45 = vcombine.low %v909_v27, %v925_v28 }
 0x188   :  { %v950_v52 = vrot.slane %v942_v50, %v3070_v44  ;;  %v741_v54 = vrot.slane %v2528_v35, %v3068_v37  ;;  %v757_v55 = vrot.slane %v2530_v36, %v3068_v37  ;;  %v1134_v56 = vpack.c.bf16 %v854_v38, %v854_v38 }
 0x189   :  { %v1144_v46 = vpack.c.bf16 %v992_v42, %v992_v42  ;;  %v1145_v51 = vpack.c.bf16 %v993_v43, %v993_v43  ;;  %v982_v53 = vrot.slane %v974_v45, %v3070_v44  ;;  %v1135_v57 = vpack.c.bf16 %v855_v39, %v855_v39 }
 0x18a   :  { %v773_v58 = vrot.slane %v2532_v48, %v3068_v37  ;;  %v789_v59 = vrot.slane %v2534_v49, %v3068_v37  ;;  %v805_v60 = vrot.slane %v791_v10, %v3070_v44  ;;  %v837_v61 = vrot.slane %v823_v11, %v3070_v44 }
 0x18b   :  { %v943_v62 = vcombine.high %v3137_v20, %v893_v21  ;;  %v975_v18 = vcombine.high %v909_v27, %v925_v28  ;;  %v1254_v63 = vsel %vm131_vm0, %v1144_v46, 0  ;;  %v1300_v0 = vsel %vm131_vm0, %v1145_v51, 0 }
 0x18c   :  { %v994_v1 = vcombine.low %v950_v52, %v982_v53  ;;  %v995_v2 = vcombine.high %v950_v52, %v982_v53  ;;  %v806_v3 = vcombine.low %v741_v54, %v757_v55  ;;  %v838_v4 = vcombine.low %v773_v58, %v789_v59 }
 0x18d   :  { %2651 = vmatmul.mubr.msk.bf16.vlgmr.msra.gmra.mxu1 %vm131_vm0, %v1134_v56  ;;  %2657 = vmatmul.mubr.msk.bf16.vlgmr.msra.gmra.mxu0 %vm131_vm0, %v1135_v57  ;;  %v856_v5 = vcombine.low %v805_v60, %v837_v61  ;;  %v857_v6 = vcombine.high %v805_v60, %v837_v61  ;;  %v957_v9 = vrot.slane %v943_v62, %v3070_v44 }
 0x18e   :  { %2661 = vmatpush3.bf16.xpose.msra.mxu1 %v1254_v63  ;;  %2667 = vmatpush3.bf16.xpose.msra.mxu0 %v1300_v0  ;;  %v1146_v7 = vpack.c.bf16 %v994_v1, %v994_v1  ;;  %v1147_v8 = vpack.c.bf16 %v995_v2, %v995_v2  ;;  %v989_v10 = vrot.slane %v975_v18, %v3070_v44 }
 0x18f   :  { %2662 = vmatprep.mubr.msk.bf16.mxu1 %vm2986_vm1, %v2985_v22  ;;  %2668 = vmatprep.mubr.msk.bf16.mxu0 %vm2986_vm1, %v2985_v22  ;;  %v1136_v11 = vpack.c.bf16 %v856_v5, %v856_v5  ;;  %v1137_v12 = vpack.c.bf16 %v857_v6, %v857_v6  ;;  %v814_v13 = vrot.slane %v806_v3, %v3070_v44 }
 0x190   :  { %2672 = vmatprep.subr.bf16.mxu1 %v2985_v22  ;;  %2678 = vmatprep.subr.bf16.mxu0 %v2985_v22  ;;  %v846_v14 = vrot.slane %v838_v4, %v3070_v44  ;;  %v1346_v16 = vsel %vm131_vm0, %v1146_v7, 0  ;;  %v1392_v17 = vsel %vm131_vm0, %v1147_v8, 0  ;;  %v996_v19 = vcombine.low %v957_v9, %v989_v10 }
 0x191   :  { %v997_v20 = vcombine.high %v957_v9, %v989_v10  ;;  %v807_v21 = vcombine.high %v741_v54, %v757_v55  ;;  %v839_v25 = vcombine.high %v773_v58, %v789_v59 }
 0x192   :  { %v858_v26 = vcombine.low %v814_v13, %v846_v14  ;;  %v859_v27 = vcombine.high %v814_v13, %v846_v14  ;;  %v1148_v28 = vpack.c.bf16 %v996_v19, %v996_v19 }
 0x193   :  { %v1149_v29 = vpack.c.bf16 %v997_v20, %v997_v20  ;;  %v821_v32 = vrot.slane %v807_v21, %v3070_v44  ;;  %v853_v33 = vrot.slane %v839_v25, %v3070_v44 }
 0x194   :  { %v1138_v30 = vpack.c.bf16 %v858_v26, %v858_v26  ;;  %v1139_v31 = vpack.c.bf16 %v859_v27, %v859_v27  ;;  %v1438_v34 = vsel %vm131_vm0, %v1148_v28, 0 }
 0x195   :  { %2663 = vmatmul.mubr.msk.bf16.vlgmr.msra.gmra.mxu1 %vm131_vm0, %v1136_v11  ;;  %2669 = vmatmul.mubr.msk.bf16.vlgmr.msra.gmra.mxu0 %vm131_vm0, %v1137_v12  ;;  %v1484_v35 = vsel %vm131_vm0, %v1149_v29, 0  ;;  %v860_v36 = vcombine.low %v821_v32, %v853_v33  ;;  %v861_v38 = vcombine.high %v821_v32, %v853_v33 }
 0x196   :  { %2673 = vmatpush3.bf16.xpose.msra.mxu1 %v1346_v16  ;;  %2679 = vmatpush3.bf16.xpose.msra.mxu0 %v1392_v17  ;;  %v300_v17 = vpop.permute.xlu1 %299 }
 0x197   :  { %2674 = vmatprep.mubr.msk.bf16.mxu1 %vm2986_vm1, %v2985_v22  ;;  %2680 = vmatprep.mubr.msk.bf16.mxu0 %vm2986_vm1, %v2985_v22  ;;  %v1140_v39 = vpack.c.bf16 %v860_v36, %v860_v36  ;;  %v1141_v40 = vpack.c.bf16 %v861_v38, %v861_v38 }
 0x198   :  { %2684 = vmatprep.subr.bf16.mxu1 %v2985_v22  ;;  %2690 = vmatprep.subr.bf16.mxu0 %v2985_v22 }
 0x19d   :  { %2675 = vmatmul.mubr.msk.bf16.vlgmr.msra.gmra.mxu1 %vm131_vm0, %v1138_v30  ;;  %2681 = vmatmul.mubr.msk.bf16.vlgmr.msra.gmra.mxu0 %vm131_vm0, %v1139_v31 }
 0x19e   :  { %2685 = vmatpush3.bf16.xpose.msra.mxu1 %v1438_v34  ;;  %2691 = vmatpush3.bf16.xpose.msra.mxu0 %v1484_v35 }
 0x19f   :  { %2686 = vmatprep.mubr.msk.bf16.mxu1 %vm2986_vm1, %v2985_v22  ;;  %2692 = vmatprep.mubr.msk.bf16.mxu0 %vm2986_vm1, %v2985_v22 }
 0x1a0   :  { %2696 = vmatprep.subr.bf16.mxu1 %v2985_v22  ;;  %2702 = vmatprep.subr.bf16.mxu0 %v2985_v22 }
 0x1a5   :  { %2687 = vmatmul.mubr.msk.bf16.vlgmr.msra.gmra.mxu1 %vm131_vm0, %v1140_v39  ;;  %2693 = vmatmul.mubr.msk.bf16.vlgmr.msra.gmra.mxu0 %vm131_vm0, %v1141_v40 }
 0x1a6   :  { %2698 = vmatprep.mubr.msk.bf16.mxu1 %vm2986_vm1, %v2985_v22  ;;  %2704 = vmatprep.mubr.msk.bf16.mxu0 %vm2986_vm1, %v2985_v22 }
 0x24d   :  { %v1198_v41 = vpop.f32.mrf.mxu1  ;;  %v1244_v15 = vpop.f32.mrf.mxu0 }
 0x24e   :  { %v1527_v47 = vsel %vm1526_vm2, %v1198_v41, -inf  ;;  %v1530_v48 = vsel %vm1526_vm2, %v1244_v15, -inf }
 0x24f   :  { %v2652_v49 = vpop.f32.mrf.mxu1  ;;  %1528 = vmax.xlane.f32.xlu0 %v1527_v47  ;;  %1531 = vmax.xlane.f32.xlu1 %v1530_v48  ;;  %v2658_v50 = vpop.f32.mrf.mxu0 }
 0x251   :  { %v1201_v42 = vpop.f32.mrf.mxu1  ;;  %v1247_v43 = vpop.f32.mrf.mxu0 }
 0x253   :  { %v2653_v45 = vpop.f32.mrf.mxu1  ;;  %v2659_v46 = vpop.f32.mrf.mxu0 }
 0x255   :  { %v1290_v51 = vpop.f32.mrf.mxu1  ;;  %v1336_v52 = vpop.f32.mrf.mxu0 }
 0x256   :  { %v1533_v53 = vsel %vm1526_vm2, %v1290_v51, -inf  ;;  %v1536_v58 = vsel %vm1526_vm2, %v1336_v52, -inf }
 0x257   :  { %v2664_v54 = vpop.f32.mrf.mxu1  ;;  %1534 = vmax.xlane.f32.xlu0 %v1533_v53  ;;  %v2670_v55 = vpop.f32.mrf.mxu0 }
 0x259   :  { %v1293_v56 = vpop.f32.mrf.mxu1  ;;  %v1339_v57 = vpop.f32.mrf.mxu0 }
 0x25b   :  { %v2665_v59 = vpop.f32.mrf.mxu1  ;;  %1537 = vmax.xlane.f32.xlu0 %v1536_v58  ;;  %v2671_v60 = vpop.f32.mrf.mxu0 }
 0x25d   :  { %v1382_v61 = vpop.f32.mrf.mxu1  ;;  %v3206_v62 = vpop.f32.mrf.mxu0 }
 0x25e   :  { %v1539_v18 = vsel %vm1526_vm2, %v1382_v61, -inf  ;;  %v1542_v63 = vsel %vm1526_vm2, %v3206_v62, -inf }
 0x25f   :  { %v2676_v0 = vpop.f32.mrf.mxu1  ;;  %1540 = vmax.xlane.f32.xlu1 %v1539_v18  ;;  %1543 = vmax.xlane.f32.xlu0 %v1542_v63  ;;  %v2682_v1 = vpop.f32.mrf.mxu0 }
 0x261   :  { %v1385_v2 = vpop.f32.mrf.mxu1  ;;  %v1431_v3 = vpop.f32.mrf.mxu0 }
 0x263   :  { %v2677_v4 = vpop.f32.mrf.mxu1  ;;  %v2683_v5 = vpop.f32.mrf.mxu0 }
 0x265   :  { %v3211_v6 = vpop.f32.mrf.mxu1  ;;  %v3213_v7 = vpop.f32.mrf.mxu0 }
 0x266   :  { %v1545_v8 = vsel %vm1526_vm2, %v3211_v6, -inf  ;;  %v1548_v9 = vsel %vm1526_vm2, %v3213_v7, -inf }
 0x267   :  { %v2688_v10 = vpop.f32.mrf.mxu1  ;;  %1546 = vmax.xlane.f32.xlu1 %v1545_v8  ;;  %1549 = vmax.xlane.f32.xlu0 %v1548_v9  ;;  %v2694_v11 = vpop.f32.mrf.mxu0 }
 0x269   :  { %v1477_v12 = vpop.f32.mrf.mxu1  ;;  %v1523_v13 = vpop.f32.mrf.mxu0 }
 0x26b   :  { %v2689_v14 = vpop.f32.mrf.mxu1  ;;  %v2695_v16 = vpop.f32.mrf.mxu0 }
 0x278   :  { %305 = vrot.lane.b32.xlu1 %v3062_v23, %s2983_s0 }
 0x27d   :  { %302 = vrot.lane.b32.xlu0 %v3062_v23, %s2980_s1 }
 0x2d8   :  { %v1529_v19 = vpop.xlane.xlu0 %1528  ;;  %v1532_v20 = vpop.xlane.xlu1 %1531 }
 0x2d9   :  { %v1551_v21 = vsub.f32 %v1198_v41, %v1529_v19  ;;  %v1552_v25 = vsub.f32 %v1244_v15, %v1532_v20 }
 0x2db   :  { %v1559_v26 = vmul.f32 1.442695, %v1551_v21  ;;  %v1561_v27 = vmul.f32 1.442695, %v1552_v25 }
 0x2dd   :  { %2857 = vpow2.f32 %v1559_v26 }
 0x2de   :  { %2859 = vpow2.f32 %v1561_v27 }
 0x2e0   :  { %v1535_v28 = vpop.xlane.xlu0 %1534 }
 0x2e1   :  { %v1553_v29 = vsub.f32 %v1290_v51, %v1535_v28 }
 0x2e3   :  { %v1563_v30 = vmul.f32 1.442695, %v1553_v29 }
 0x2e4   :  { %v1538_v31 = vpop.xlane.xlu0 %1537 }
 0x2e5   :  { %2861 = vpow2.f32 %v1563_v30  ;;  %v1554_v32 = vsub.f32 %v1336_v52, %v1538_v31 }
 0x2e7   :  { %v1565_v33 = vmul.f32 1.442695, %v1554_v32 }
 0x2e8   :  { %v1541_v34 = vpop.xlane.xlu1 %1540  ;;  %v3229_v41 = vpop.xlane.xlu0 %1543 }
 0x2e9   :  { %2863 = vpow2.f32 %v1565_v33  ;;  %v1555_v35 = vsub.f32 %v1382_v61, %v1541_v34 }
 0x2ea   :  { %v3223_v36 = vpop.eup %2857 }
 0x2eb   :  { %v3225_v38 = vpop.eup %2859  ;;  %v1567_v39 = vmul.f32 1.442695, %v1555_v35  ;;  %v1575_v40 = vsel %vm1526_vm2, %v3223_v36, 0.0  ;;  %v1556_v35 = vsub.f32 %v3206_v62, %v3229_v41 }
 0x2ec   :  { %1576 = vadd.xlane.f32.xlu1 %v1575_v40  ;;  %v1578_v15 = vsel %vm1526_vm2, %v3225_v38, 0.0 }
 0x2ed   :  { %2865 = vpow2.f32 %v1567_v39  ;;  %1579 = vadd.xlane.f32.xlu0 %v1578_v15  ;;  %v1569_v39 = vmul.f32 1.442695, %v1556_v35 }
 0x2ef   :  { %2867 = vpow2.f32 %v1569_v39 }
 0x2f0   :  { %v3233_v47 = vpop.xlane.xlu1 %1546  ;;  %v3235_v48 = vpop.xlane.xlu0 %1549 }
 0x2f1   :  { %v1557_v40 = vsub.f32 %v3211_v6, %v3233_v47  ;;  %v1558_v6 = vsub.f32 %v3213_v7, %v3235_v48 }
 0x2f2   :  { %v3237_v49 = vpop.eup %2861 }
 0x2f3   :  { %v1581_v50 = vsel %vm1526_vm2, %v3237_v49, 0.0  ;;  %v1571_v15 = vmul.f32 1.442695, %v1557_v40  ;;  %v1573_v41 = vmul.f32 1.442695, %v1558_v6 }
 0x2f4   :  { %1582 = vadd.xlane.f32.xlu1 %v1581_v50  ;;  %v306_v42 = vpop.permute.xlu1 %305  ;;  %v303_v43 = vpop.permute.xlu0 %302 }
 0x2f5   :  { %v606_v45 = vcombine.low %v300_v17, %v306_v42  ;;  %v607_v46 = vcombine.high %v300_v17, %v306_v42  ;;  %v590_v51 = vcombine.low %v3062_v23, %v303_v43  ;;  %v591_v53 = vcombine.high %v3062_v23, %v303_v43 }
 0x2f6   :  { %v3242_v52 = vpop.eup %2863  ;;  %2869 = vpow2.f32 %v1571_v15 }
 0x2f7   :  { %v614_v54 = vrot.slane %v606_v45, %v3068_v37  ;;  %v621_v55 = vrot.slane %v607_v46, %v3068_v37  ;;  %v598_v56 = vrot.slane %v590_v51, %v3068_v37  ;;  %v1584_v57 = vsel %vm1526_vm2, %v3242_v52, 0.0 }
 0x2f8   :  { %v605_v58 = vrot.slane %v591_v53, %v3068_v37  ;;  %1585 = vadd.xlane.f32.xlu0 %v1584_v57  ;;  %2871 = vpow2.f32 %v1573_v41 }
 0x2f9   :  { %v654_v59 = vcombine.low %v598_v56, %v614_v54  ;;  %v655_v60 = vcombine.high %v598_v56, %v614_v54 }
 0x2fa   :  { %v3251_v61 = vpop.eup %2865  ;;  %v670_v18 = vcombine.low %v605_v58, %v621_v55  ;;  %v671_v63 = vcombine.high %v605_v58, %v621_v55 }
 0x2fb   :  { %v662_v23 = vrot.slane %v654_v59, %v3070_v44  ;;  %v669_v0 = vrot.slane %v655_v60, %v3070_v44  ;;  %v1587_v1 = vsel %vm1526_vm2, %v3251_v61, 0.0 }
 0x2fc   :  { %v678_v2 = vrot.slane %v670_v18, %v3070_v44  ;;  %v685_v3 = vrot.slane %v671_v63, %v3070_v44  ;;  %1588 = vadd.xlane.f32.xlu0 %v1587_v1  ;;  %v3279_v50 = vpop.eup %2867 }
 0x2fd   :  { %v2543_v4 = vcombine.low %v662_v23, %v669_v0  ;;  %v2545_v5 = vcombine.high %v662_v23, %v669_v0  ;;  %v1590_v42 = vsel %vm1526_vm2, %v3279_v50, 0.0 }
 0x2fe   :  { %v2547_v8 = vcombine.low %v678_v2, %v685_v3  ;;  %v2549_v9 = vcombine.high %v678_v2, %v685_v3 }
 0x2ff   :  { %v1006_v10 = vrot.slane %v2543_v4, %v3068_v37  ;;  %v1022_v11 = vrot.slane %v2545_v5, %v3068_v37 }
 0x300   :  { %v1038_v12 = vrot.slane %v2547_v8, %v3068_v37  ;;  %v1054_v13 = vrot.slane %v2549_v9, %v3068_v37 }
 0x301   :  { %v1062_v14 = vcombine.low %v1006_v10, %v1022_v11  ;;  %v1063_v16 = vcombine.high %v1006_v10, %v1022_v11 }
 0x302   :  { %v1094_v17 = vcombine.low %v1038_v12, %v1054_v13  ;;  %v1095_v19 = vcombine.high %v1038_v12, %v1054_v13 }
 0x303   :  { %v1070_v20 = vrot.slane %v1062_v14, %v3070_v44  ;;  %v1077_v21 = vrot.slane %v1063_v16, %v3070_v44  ;;  %v3283_v43 = vpop.eup %2869 }
 0x304   :  { %v1102_v25 = vrot.slane %v1094_v17, %v3070_v44  ;;  %v1109_v26 = vrot.slane %v1095_v19, %v3070_v44  ;;  %v1593_v62 = vsel %vm1526_vm2, %v3283_v43, 0.0 }
 0x305   :  { %312 = vrot.lane.b32.xlu1 %v3066_v24, %s2980_s1  ;;  %v3291_v47 = vpop.eup %2871 }
 0x306   :  { %v1126_v27 = vcombine.low %v1070_v20, %v1102_v25  ;;  %v1127_v28 = vcombine.high %v1070_v20, %v1102_v25  ;;  %v1128_v29 = vcombine.low %v1077_v21, %v1109_v26  ;;  %v1129_v30 = vcombine.high %v1077_v21, %v1109_v26 }
 0x307   :  { %v1596_v45 = vsel %vm1526_vm2, %v3291_v47, 0.0 }
 0x308   :  { %v1150_v31 = vpack.c.bf16 %v1126_v27, %v1126_v27  ;;  %v1151_v32 = vpack.c.bf16 %v1127_v28, %v1127_v28  ;;  %v1152_v48 = vpack.c.bf16 %v1128_v29, %v1128_v29  ;;  %v1153_v58 = vpack.c.bf16 %v1129_v30, %v1129_v30 }
 0x30a   :  { %v1628_v33 = vsel %vm1626_vm3, %v1150_v31, 0  ;;  %v1674_v34 = vsel %vm1626_vm3, %v1151_v32, 0  ;;  %v1720_v18 = vsel %vm1626_vm3, %v1152_v48, 0  ;;  %v1766_v63 = vsel %vm1626_vm3, %v1153_v58, 0 }
 0x30b   :  { %2697 = vmatpush3.bf16.msra.mxu1 %v1628_v33  ;;  %2703 = vmatpush3.bf16.msra.mxu0 %v1674_v34 }
 0x30c   :  { %2708 = vmatprep.subr.bf16.mxu1 %v2985_v22  ;;  %2714 = vmatprep.subr.bf16.mxu0 %v2985_v22 }
 0x312   :  { %309 = vrot.lane.b32.xlu0 %v3066_v24, %s2984_s2 }
 0x329   :  { %1591 = vadd.xlane.f32.xlu1 %v1590_v42 }
 0x331   :  { %1594 = vadd.xlane.f32.xlu0 %v1593_v62 }
 0x33a   :  { %315 = vrot.lane.b32.xlu1 %v3066_v24, %s2983_s0 }
 0x35e   :  { %1597 = vadd.xlane.f32.xlu1 %v1596_v45 }
 0x375   :  { %v1577_v46 = vpop.xlane.xlu1 %1576 }
 0x376   :  { %2873 = vrcp.f32 %v1577_v46  ;;  %v1580_v51 = vpop.xlane.xlu0 %1579 }
 0x377   :  { %2875 = vrcp.f32 %v1580_v51 }
 0x37d   :  { %v1583_v53 = vpop.xlane.xlu1 %1582 }
 0x37e   :  { %2877 = vrcp.f32 %v1583_v53 }
 0x381   :  { %v1586_v54 = vpop.xlane.xlu0 %1585  ;;  %v313_v3 = vpop.permute.xlu1 %312 }
 0x382   :  { %2879 = vrcp.f32 %v1586_v54  ;;  %v622_v5 = vcombine.low %v3066_v24, %v313_v3  ;;  %v623_v8 = vcombine.high %v3066_v24, %v313_v3 }
 0x383   :  { %v2874_v55 = vpop.eup %2873 }
 0x384   :  { %v2876_v56 = vpop.eup %2875  ;;  %v1607_v7 = vmul.f32 %v2874_v55, %v3223_v36  ;;  %v630_v12 = vrot.slane %v622_v5, %v3068_v37  ;;  %v637_v13 = vrot.slane %v623_v8, %v3068_v37  ;;  %v2844_v8 = vld [vmem:[#allocation7 + $0x10] sm:$0xff]  }
 0x385   :  { %v1608_v57 = vmul.f32 %v2876_v56, %v3225_v38  ;;  %v1589_v4 = vpop.xlane.xlu0 %1588 }
 0x386   :  { %v1615_v59 = vpack.c.bf16 %v1607_v7, %v1607_v7  ;;  %2881 = vrcp.f32 %v1589_v4 }
 0x387   :  { %v1616_v60 = vpack.c.bf16 %v1608_v57, %v1608_v57 }
 0x388   :  { %2699 = vmatmul.mubr.msk.bf16.vlgmr.msra.gmra.mxu1 %vm1526_vm2, %v1615_v59 }
 0x389   :  { %2705 = vmatmul.mubr.msk.bf16.vlgmr.msra.gmra.mxu0 %vm1526_vm2, %v1616_v60  ;;  %2709 = vmatpush3.bf16.msra.mxu1 %v1720_v18  ;;  %v310_v9 = vpop.permute.xlu0 %309 }
 0x38a   :  { %2715 = vmatpush3.bf16.msra.mxu0 %v1766_v63  ;;  %2710 = vmatprep.mubr.msk.bf16.mxu1 %vm2986_vm1, %v2985_v22 }
 0x38b   :  { %v2878_v36 = vpop.eup %2877  ;;  %2716 = vmatprep.mubr.msk.bf16.mxu0 %vm2986_vm1, %v2985_v22  ;;  %2720 = vmatprep.subr.bf16.mxu1 %v2985_v22 }
 0x38c   :  { %v1609_v38 = vmul.f32 %v2878_v36, %v3237_v49  ;;  %2726 = vmatprep.subr.bf16.mxu0 %v2985_v22 }
 0x38e   :  { %v1617_v23 = vpack.c.bf16 %v1609_v38, %v1609_v38 }
 0x38f   :  { %v2880_v0 = vpop.eup %2879 }
 0x390   :  { %2711 = vmatmul.mubr.msk.bf16.vlgmr.msra.gmra.mxu1 %vm1526_vm2, %v1617_v23  ;;  %v1610_v1 = vmul.f32 %v2880_v0, %v3242_v52  ;;  %v2841_v0 = vld [vmem:[#allocation7 + $0x8] sm:$0xff]  }
 0x391   :  { %2722 = vmatprep.mubr.msk.bf16.mxu1 %vm2986_vm1, %v2985_v22 }
 0x392   :  { %v1618_v2 = vpack.c.bf16 %v1610_v1, %v1610_v1 }
 0x393   :  { %v2882_v6 = vpop.eup %2881 }
 0x394   :  { %2717 = vmatmul.mubr.msk.bf16.vlgmr.msra.gmra.mxu0 %vm1526_vm2, %v1618_v2  ;;  %v1611_v57 = vmul.f32 %v2882_v6, %v3251_v61  ;;  %v2843_v2 = vld [vmem:[#allocation7] sm:$0xff]   ;;  %v2853_v6 = vld [vmem:[#allocation7 + $0x68] sm:$0xff]  }
 0x395   :  { %2728 = vmatprep.mubr.msk.bf16.mxu0 %vm2986_vm1, %v2985_v22 }
 0x396   :  { %v1619_v36 = vpack.c.bf16 %v1611_v57, %v1611_v57 }
 0x3b2   :  { %v1592_v49 = vpop.xlane.xlu1 %1591 }
 0x3b3   :  { %2883 = vrcp.f32 %v1592_v49  ;;  %v2842_v49 = vld [vmem:[#allocation7 + $0x18] sm:$0xff]  }
 0x3b6   :  { %v316_v10 = vpop.permute.xlu1 %315 }
 0x3b7   :  { %v638_v11 = vcombine.low %v310_v9, %v316_v10  ;;  %v639_v52 = vcombine.high %v310_v9, %v316_v10  ;;  %v2845_v10 = vld [vmem:[#allocation7 + $0x28] sm:$0xff]  }
 0x3b9   :  { %v646_v14 = vrot.slane %v638_v11, %v3068_v37  ;;  %v653_v16 = vrot.slane %v639_v52, %v3068_v37 }
 0x3ba   :  { %v1595_v28 = vpop.xlane.xlu0 %1594 }
 0x3bb   :  { %v686_v17 = vcombine.low %v630_v12, %v646_v14  ;;  %v687_v19 = vcombine.high %v630_v12, %v646_v14  ;;  %v702_v20 = vcombine.low %v637_v13, %v653_v16  ;;  %v703_v21 = vcombine.high %v637_v13, %v653_v16  ;;  %v2847_v12 = vld [vmem:[#allocation7 + $0x38] sm:$0xff]  }
 0x3bc   :  { %2885 = vrcp.f32 %v1595_v28 }
 0x3bd   :  { %v694_v24 = vrot.slane %v686_v17, %v3070_v44  ;;  %v701_v25 = vrot.slane %v687_v19, %v3070_v44  ;;  %v710_v26 = vrot.slane %v702_v20, %v3070_v44  ;;  %v717_v27 = vrot.slane %v703_v21, %v3070_v44  ;;  %v2846_v17 = vld [vmem:[#allocation7 + $0x20] sm:$0xff]   ;;  %v2848_v20 = vld [vmem:[#allocation7 + $0x30] sm:$0xff]  }
 0x3bf   :  { %v2544_v29 = vcombine.low %v694_v24, %v701_v25  ;;  %v2546_v30 = vcombine.high %v694_v24, %v701_v25  ;;  %v2548_v31 = vcombine.low %v710_v26, %v717_v27  ;;  %v2550_v32 = vcombine.high %v710_v26, %v717_v27  ;;  %v2849_v26 = vld [vmem:[#allocation7 + $0x48] sm:$0xff]  }
 0x3c0   :  { %v2884_v53 = vpop.eup %2883 }
 0x3c1   :  { %v1013_v33 = vrot.slane %v2544_v29, %v3068_v37  ;;  %v1029_v34 = vrot.slane %v2546_v30, %v3068_v37  ;;  %v1045_v35 = vrot.slane %v2548_v31, %v3068_v37  ;;  %v1061_v39 = vrot.slane %v2550_v32, %v3068_v37  ;;  %v2850_v31 = vld [vmem:[#allocation7 + $0x58] sm:$0xff]   ;;  %v2851_v32 = vld [vmem:[#allocation7 + $0x40] sm:$0xff]  }
 0x3c2   :  { %v1612_v58 = vmul.f32 %v2884_v53, %v3279_v50 }
 0x3c3   :  { %v1078_v40 = vcombine.low %v1013_v33, %v1029_v34  ;;  %v1110_v15 = vcombine.low %v1045_v35, %v1061_v39  ;;  %v1079_v42 = vcombine.high %v1013_v33, %v1029_v34  ;;  %v1111_v62 = vcombine.high %v1045_v35, %v1061_v39 }
 0x3c4   :  { %v1620_v38 = vpack.c.bf16 %v1612_v58, %v1612_v58 }
 0x3c5   :  { %v1086_v41 = vrot.slane %v1078_v40, %v3070_v44  ;;  %v1118_v45 = vrot.slane %v1110_v15, %v3070_v44  ;;  %v1093_v46 = vrot.slane %v1079_v42, %v3070_v44  ;;  %v1125_v51 = vrot.slane %v1111_v62, %v3070_v44  ;;  %v2852_v40 = vld [vmem:[#allocation7 + $0x50] sm:$0xff]  }
 0x3c7   :  { %v1130_v54 = vcombine.low %v1086_v41, %v1118_v45  ;;  %v1131_v55 = vcombine.high %v1086_v41, %v1118_v45  ;;  %v1132_v56 = vcombine.low %v1093_v46, %v1125_v51  ;;  %v1133_v7 = vcombine.high %v1093_v46, %v1125_v51  ;;  %v2855_v46 = vld [vmem:[#allocation7 + $0x78] sm:$0xff]  }
 0x3c9   :  { %v1154_v48 = vpack.c.bf16 %v1130_v54, %v1130_v54  ;;  %v1155_v37 = vpack.c.bf16 %v1131_v55, %v1131_v55  ;;  %v1156_v18 = vpack.c.bf16 %v1132_v56, %v1132_v56  ;;  %v1157_v63 = vpack.c.bf16 %v1133_v7, %v1133_v7  ;;  %v2886_v44 = vpop.eup %2885  ;;  %v2854_v56 = vld [vmem:[#allocation7 + $0x60] sm:$0xff]   ;;  %v2856_v7 = vld [vmem:[#allocation7 + $0x70] sm:$0xff]  }
 0x3ca   :  { %v1613_v23 = vmul.f32 %v2886_v44, %v3283_v43 }
 0x3cb   :  { %v1812_v59 = vsel %vm1626_vm3, %v1154_v48, 0  ;;  %v1858_v60 = vsel %vm1626_vm3, %v1155_v37, 0  ;;  %v1904_v61 = vsel %vm1626_vm3, %v1156_v18, 0  ;;  %v1950_v50 = vsel %vm1626_vm3, %v1157_v63, 0 }
 0x3cc   :  { %2721 = vmatpush3.bf16.msra.mxu1 %v1812_v59  ;;  %2727 = vmatpush3.bf16.msra.mxu0 %v1858_v60  ;;  %v1621_v1 = vpack.c.bf16 %v1613_v23, %v1613_v23 }
 0x3cd   :  { %2732 = vmatprep.subr.bf16.mxu1 %v2985_v22  ;;  %2738 = vmatprep.subr.bf16.mxu0 %v2985_v22 }
 0x3cf   :  { %2723 = vmatmul.mubr.msk.bf16.vlgmr.msra.gmra.mxu1 %vm1526_vm2, %v1619_v36  ;;  %2729 = vmatmul.mubr.msk.bf16.vlgmr.msra.gmra.mxu0 %vm1526_vm2, %v1620_v38 }
 0x3d0   :  { %2733 = vmatpush3.bf16.msra.mxu1 %v1904_v61  ;;  %2739 = vmatpush3.bf16.msra.mxu0 %v1950_v50 }
 0x3d1   :  { %2734 = vmatprep.mubr.msk.bf16.mxu1 %vm2986_vm1, %v2985_v22  ;;  %2740 = vmatprep.mubr.msk.bf16.mxu0 %vm2986_vm1, %v2985_v22 }
 0x3d2   :  { %2744 = vmatprep.subr.bf16.mxu1 %v2985_v22  ;;  %2752 = vmatprep.subr.bf16.mxu0 %v2985_v22 }
 0x3d7   :  { %2735 = vmatmul.mubr.msk.bf16.vlgmr.msra.gmra.mxu1 %vm1526_vm2, %v1621_v1 }
 0x3d8   :  { %2745 = vmatpush3.bf16.msra.mxu1 %v2841_v0  ;;  %2748 = vmatprep.mubr.msk.bf16.mxu1 %vm2986_vm1, %v2985_v22 }
 0x3d9   :  { %2746 = vmatprep.subr.bf16.mxu1 %v2985_v22 }
 0x3dc   :  { %2747 = vmatpush3.bf16.msra.mxu1 %v2843_v2 }
 0x3dd   :  { %2760 = vmatprep.subr.bf16.mxu1 %v2985_v22 }
 0x3e7   :  { %v1598_v43 = vpop.xlane.xlu1 %1597 }
 0x3e8   :  { %2887 = vrcp.f32 %v1598_v43 }
 0x3f5   :  { %v2888_v3 = vpop.eup %2887 }
 0x3f6   :  { %v1614_v4 = vmul.f32 %v2888_v3, %v3291_v47 }
 0x3f8   :  { %v1622_v5 = vpack.c.bf16 %v1614_v4, %v1614_v4 }
 0x3fa   :  { %2741 = vmatmul.mubr.msk.bf16.vlgmr.msra.gmra.mxu0 %vm1526_vm2, %v1622_v5 }
 0x3fb   :  { %2753 = vmatpush3.bf16.msra.mxu0 %v2842_v49  ;;  %2756 = vmatprep.mubr.msk.bf16.mxu0 %vm2986_vm1, %v2985_v22 }
 0x3fc   :  { %2754 = vmatprep.subr.bf16.mxu0 %v2985_v22 }
 0x3ff   :  { %2755 = vmatpush3.bf16.msra.mxu0 %v2844_v8 }
 0x400   :  { %2768 = vmatprep.subr.bf16.mxu0 %v2985_v22 }
 0x448   :  { %v1664_v9 = vpop.f32.mrf.mxu1 }
 0x449   :  { %v1992_v11 = vpack.c.bf16 %v1664_v9, %v1664_v9  ;;  %v1710_v52 = vpop.f32.mrf.mxu0 }
 0x44a   :  { %v1993_v47 = vpack.c.bf16 %v1710_v52, %v1710_v52  ;;  %v2700_v13 = vpop.f32.mrf.mxu1 }
 0x44b   :  { %v2706_v14 = vpop.f32.mrf.mxu0  ;;  %2749 = vmatmul.mubr.msk.bf16.vlgmr.msra.gmra.mxu1 %vm131_vm0, %v1992_v11 }
 0x44c   :  { %2757 = vmatmul.mubr.msk.bf16.vlgmr.msra.gmra.mxu0 %vm131_vm0, %v1993_v47  ;;  %v1667_v16 = vpop.f32.mrf.mxu1  ;;  %2761 = vmatpush3.bf16.msra.mxu1 %v2845_v10 }
 0x44d   :  { %v1713_v19 = vpop.f32.mrf.mxu0  ;;  %2762 = vmatprep.subr.bf16.mxu1 %v2985_v22  ;;  %2769 = vmatpush3.bf16.msra.mxu0 %v2847_v12 }
 0x44e   :  { %v2701_v21 = vpop.f32.mrf.mxu1  ;;  %2764 = vmatprep.mubr.msk.bf16.mxu1 %vm2986_vm1, %v2985_v22  ;;  %2770 = vmatprep.subr.bf16.mxu0 %v2985_v22 }
 0x44f   :  { %v2707_v24 = vpop.f32.mrf.mxu0  ;;  %2772 = vmatprep.mubr.msk.bf16.mxu0 %vm2986_vm1, %v2985_v22 }
 0x450   :  { %v1756_v25 = vpop.f32.mrf.mxu1  ;;  %2763 = vmatpush3.bf16.msra.mxu1 %v2846_v17 }
 0x451   :  { %v1994_v27 = vpack.c.bf16 %v1756_v25, %v1756_v25  ;;  %2771 = vmatpush3.bf16.msra.mxu0 %v2848_v20  ;;  %2776 = vmatprep.subr.bf16.mxu1 %v2985_v22 }
 0x452   :  { %v2712_v28 = vpop.f32.mrf.mxu1  ;;  %2784 = vmatprep.subr.bf16.mxu0 %v2985_v22 }
 0x453   :  { %2765 = vmatmul.mubr.msk.bf16.vlgmr.msra.gmra.mxu1 %vm131_vm0, %v1994_v27 }
 0x454   :  { %v1759_v29 = vpop.f32.mrf.mxu1  ;;  %v1802_v30 = vpop.f32.mrf.mxu0  ;;  %2777 = vmatpush3.bf16.msra.mxu1 %v2849_v26  ;;  %2780 = vmatprep.mubr.msk.bf16.mxu1 %vm2986_vm1, %v2985_v22 }
 0x455   :  { %v1995_v33 = vpack.c.bf16 %v1802_v30, %v1802_v30  ;;  %2778 = vmatprep.subr.bf16.mxu1 %v2985_v22 }
 0x456   :  { %v2713_v34 = vpop.f32.mrf.mxu1  ;;  %v2718_v35 = vpop.f32.mrf.mxu0 }
 0x457   :  { %2773 = vmatmul.mubr.msk.bf16.vlgmr.msra.gmra.mxu0 %vm131_vm0, %v1995_v33 }
 0x458   :  { %v1805_v39 = vpop.f32.mrf.mxu0  ;;  %2785 = vmatpush3.bf16.msra.mxu0 %v2850_v31  ;;  %2779 = vmatpush3.bf16.msra.mxu1 %v2851_v32 }
 0x459   :  { %2786 = vmatprep.subr.bf16.mxu0 %v2985_v22  ;;  %2788 = vmatprep.mubr.msk.bf16.mxu0 %vm2986_vm1, %v2985_v22 }
 0x45a   :  { %v2719_v15 = vpop.f32.mrf.mxu0  ;;  %2792 = vmatprep.subr.bf16.mxu1 %v2985_v22 }
 0x45c   :  { %2787 = vmatpush3.bf16.msra.mxu0 %v2852_v40 }
 0x45d   :  { %2800 = vmatprep.subr.bf16.mxu0 %v2985_v22 }
 0x48f   :  { %v1848_v42 = vpop.f32.mrf.mxu1  ;;  %v1894_v62 = vpop.f32.mrf.mxu0 }
 0x490   :  { %v1996_v41 = vpack.c.bf16 %v1848_v42, %v1848_v42  ;;  %v1997_v45 = vpack.c.bf16 %v1894_v62, %v1894_v62 }
 0x491   :  { %v2724_v51 = vpop.f32.mrf.mxu1  ;;  %v2730_v53 = vpop.f32.mrf.mxu0 }
 0x492   :  { %2781 = vmatmul.mubr.msk.bf16.vlgmr.msra.gmra.mxu1 %vm131_vm0, %v1996_v41  ;;  %2789 = vmatmul.mubr.msk.bf16.vlgmr.msra.gmra.mxu0 %vm131_vm0, %v1997_v45  ;;  %v2591_v41 = vld [vmem:[%s3409_s3] ss:$0 sm:$0xff] }
 0x493   :  { %v1851_v54 = vpop.f32.mrf.mxu1  ;;  %v1897_v55 = vpop.f32.mrf.mxu0  ;;  %2793 = vmatpush3.bf16.msra.mxu1 %v2853_v6  ;;  %2796 = vmatprep.mubr.msk.bf16.mxu1 %vm2986_vm1, %v2985_v22 }
 0x494   :  { %2794 = vmatprep.subr.bf16.mxu1 %v2985_v22  ;;  %2801 = vmatpush3.bf16.msra.mxu0 %v2855_v46 }
 0x495   :  { %v2725_v48 = vpop.f32.mrf.mxu1  ;;  %v2731_v37 = vpop.f32.mrf.mxu0  ;;  %2802 = vmatprep.subr.bf16.mxu0 %v2985_v22  ;;  %2804 = vmatprep.mubr.msk.bf16.mxu0 %vm2986_vm1, %v2985_v22 }
 0x497   :  { %v1940_v57 = vpop.f32.mrf.mxu1  ;;  %2795 = vmatpush3.bf16.msra.mxu1 %v2854_v56 }
 0x498   :  { %v1998_v58 = vpack.c.bf16 %v1940_v57, %v1940_v57  ;;  %2803 = vmatpush3.bf16.msra.mxu0 %v2856_v7 }
 0x499   :  { %v2736_v59 = vpop.f32.mrf.mxu1 }
 0x49a   :  { %2797 = vmatmul.mubr.msk.bf16.vlgmr.msra.gmra.mxu1 %vm131_vm0, %v1998_v58 }
 0x49b   :  { %v1943_v60 = vpop.f32.mrf.mxu1 }
 0x49d   :  { %v2737_v18 = vpop.f32.mrf.mxu1 }
 0x4ba   :  { %v1986_v63 = vpop.f32.mrf.mxu0 }
 0x4bb   :  { %v1999_v44 = vpack.c.bf16 %v1986_v63, %v1986_v63 }
 0x4bc   :  { %v2742_v36 = vpop.f32.mrf.mxu0 }
 0x4bd   :  { %2805 = vmatmul.mubr.msk.bf16.vlgmr.msra.gmra.mxu0 %vm131_vm0, %v1999_v44 }
 0x4be   :  { %v1989_v38 = vpop.f32.mrf.mxu0 }
 0x4c0   :  { %v2743_v61 = vpop.f32.mrf.mxu0 }
 0x50b   :  { %v2081_v50 = vpop.f32.mrf.mxu1 }
 0x50c   :  { %v2472_v23 = vsel %vm131_vm0, %v2081_v50, 0.0  ;;  %v2136_v22 = vpop.f32.mrf.mxu0 }
 0x50d   :  { %v2473_v0 = vsel %vm131_vm0, %v2136_v22, 0.0  ;;  %v2750_v1 = vpop.f32.mrf.mxu1 }
 0x50e   :  { %v2474_v2 = vadd.f32 %v2473_v0, %v2472_v23  ;;  %v2758_v43 = vpop.f32.mrf.mxu0 }
 0x50f   :  { %v2084_v3 = vpop.f32.mrf.mxu1 }
 0x510   :  { %v2139_v4 = vpop.f32.mrf.mxu0 }
 0x511   :  { %v2751_v49 = vpop.f32.mrf.mxu1 }
 0x512   :  { %v2759_v5 = vpop.f32.mrf.mxu0 }
 0x513   :  { %v2191_v8 = vpop.f32.mrf.mxu1 }
 0x514   :  { %v2475_v9 = vsel %vm131_vm0, %v2191_v8, 0.0 }
 0x515   :  { %v2476_v10 = vadd.f32 %v2475_v9, %v2474_v2  ;;  %v2766_v11 = vpop.f32.mrf.mxu1 }
 0x517   :  { %v2194_v52 = vpop.f32.mrf.mxu1  ;;  %v2246_v12 = vpop.f32.mrf.mxu0 }
 0x518   :  { %v2477_v47 = vsel %vm131_vm0, %v2246_v12, 0.0 }
 0x519   :  { %v2478_v13 = vadd.f32 %v2477_v47, %v2476_v10  ;;  %v2767_v14 = vpop.f32.mrf.mxu1  ;;  %v2774_v16 = vpop.f32.mrf.mxu0 }
 0x51b   :  { %v2249_v17 = vpop.f32.mrf.mxu0 }
 0x51d   :  { %v2775_v19 = vpop.f32.mrf.mxu0 }
 0x552   :  { %v2301_v20 = vpop.f32.mrf.mxu1  ;;  %v2356_v21 = vpop.f32.mrf.mxu0 }
 0x553   :  { %v2479_v34 = vsel %vm131_vm0, %v2301_v20, 0.0  ;;  %v2481_v39 = vsel %vm131_vm0, %v2356_v21, 0.0 }
 0x554   :  { %v2782_v24 = vpop.f32.mrf.mxu1  ;;  %v2790_v25 = vpop.f32.mrf.mxu0  ;;  %v2480_v35 = vadd.f32 %v2479_v34, %v2478_v13 }
 0x556   :  { %v2304_v26 = vpop.f32.mrf.mxu1  ;;  %v2359_v27 = vpop.f32.mrf.mxu0  ;;  %v2482_v15 = vadd.f32 %v2481_v39, %v2480_v35 }
 0x558   :  { %v2783_v28 = vpop.f32.mrf.mxu1  ;;  %v2791_v29 = vpop.f32.mrf.mxu0 }
 0x55a   :  { %v2411_v30 = vpop.f32.mrf.mxu1 }
 0x55b   :  { %v2483_v40 = vsel %vm131_vm0, %v2411_v30, 0.0 }
 0x55c   :  { %v2798_v31 = vpop.f32.mrf.mxu1  ;;  %v2484_v42 = vadd.f32 %v2483_v40, %v2482_v15 }
 0x55e   :  { %v2414_v32 = vpop.f32.mrf.mxu1 }
 0x560   :  { %v2799_v33 = vpop.f32.mrf.mxu1 }
 0x57d   :  { %v2466_v62 = vpop.f32.mrf.mxu0 }
 0x57e   :  { %v2485_v6 = vsel %vm131_vm0, %v2466_v62, 0.0 }
 0x57f   :  { %v2486_v45 = vadd.f32 %v2485_v6, %v2484_v42  ;;  %v2806_v46 = vpop.f32.mrf.mxu0 }
 0x581   :  { %v2494_v51 = vadd.f32 %v2591_v41, %v2486_v45  ;;  %v2469_v53 = vpop.f32.mrf.mxu0 }
 0x583   :  { %2495 = vst.msk [vmem:[#allocation8] sm:$0xff] %vm131_vm0, %v2494_v51  ;;  %v2807_v54 = vpop.f32.mrf.mxu0 }
 0x584   :  { %2960 = shalt.err (!%p2957_p5)
}
 0x585   :  { %2505 = dma.vmem_to_hbm [thread:$0]  %s2503_s10, 128, %s3410_s4, [#allocation4]  }
 0x586   :  { %2973 = dma.done.wait [#allocation4], 128  }
 0x587   :  { %2974 = vsyncadd [#allocation4], 4294967168 }
 0x588   :  { %2509 = vsyncpa [#allocation3], 1 }
 0x589   :  { %2510 = vsyncpa [#allocation6], 1 }
 0x58a   :  { %2511 = vsyncpa [#allocation4], 1 }

</bundles_post_ra>
